<compile_context>
chip_gen: v7x
topology: tpu7x:2x2x1
jax: 0.10.0
libtpu: 0.0.40
codegen_flags: <defaults>
</compile_context>

<pallas_src>
import jax
import jax.numpy as jnp
from jax.experimental import pallas as pl
from jax.experimental.pallas import tpu as pltpu

LANE = 128     # TPU lane width (last-dim tiling unit)
SUBLANE = 8    # f32 sublane tiling unit


def _round_up(n, m):
    return ((n + m - 1) // m) * m


def _mlp_kernel(x_ref, w1_ref, b1_ref, w2_ref, b2_ref, w3_ref, b3_ref, o_ref):
    # ---- hidden layer 1: Linear -> ReLU -> Dropout(identity in eval) ----
    h = jnp.dot(x_ref[...], w1_ref[...], preferred_element_type=jnp.float32)
    h = jnp.maximum(h + b1_ref[...], 0.0)

    # ---- hidden layer 2: Linear -> ReLU -> Dropout(identity in eval) ----
    h = jnp.dot(h.astype(jnp.bfloat16), w2_ref[...],
                preferred_element_type=jnp.float32)
    h = jnp.maximum(h + b2_ref[...], 0.0)

    # ---- output layer: Linear -> sigmoid ----
    y = jnp.dot(h.astype(jnp.bfloat16), w3_ref[...],
                preferred_element_type=jnp.float32)
    y = y + b3_ref[...]
    o_ref[...] = jax.nn.sigmoid(y)


def multilayer_dnn_forward(x, params, *, batch_tile=128):
    """Full MLP forward in one fused Pallas kernel, tiled over the batch axis."""
    (w1, b1), (w2, b2), (w3, b3) = params
    batch, in_features = x.shape
    h1, h2, out_features = w1.shape[1], w2.shape[1], w3.shape[1]

    # Pad every feature dim to the 128-lane width; pad batch to the tile size.
    in_p = _round_up(in_features, LANE)
    h1_p = _round_up(h1, LANE)
    h2_p = _round_up(h2, LANE)
    out_p = _round_up(out_features, LANE)

    tb = min(batch_tile, _round_up(batch, SUBLANE))
    full_batch = _round_up(batch, tb)
    grid_b = full_batch // tb

    def pad2(a, rows, cols, dtype):
        out = jnp.zeros((rows, cols), dtype)
        return out.at[: a.shape[0], : a.shape[1]].set(a.astype(dtype))

    # bf16 matmul operands (halves HBM->VMEM bytes), f32 biases.
    x_p = pad2(x, full_batch, in_p, jnp.bfloat16)
    w1_p = pad2(w1, in_p, h1_p, jnp.bfloat16)
    w2_p = pad2(w2, h1_p, h2_p, jnp.bfloat16)
    w3_p = pad2(w3, h2_p, out_p, jnp.bfloat16)
    b1_p = pad2(b1, 1, h1_p, jnp.float32)
    b2_p = pad2(b2, 1, h2_p, jnp.float32)
    b3_p = pad2(b3, 1, out_p, jnp.float32)

    tile_map = lambda i: (i, 0)   # batch-tiled operands (x, out)
    const_map = lambda i: (0, 0)  # VMEM-resident weights/biases: same block every step

    out = pl.pallas_call(
        _mlp_kernel,
        out_shape=jax.ShapeDtypeStruct((full_batch, out_p), jnp.float32),
        grid=(grid_b,),
        in_specs=[
            pl.BlockSpec((tb, in_p), tile_map),
            pl.BlockSpec((in_p, h1_p), const_map),
            pl.BlockSpec((1, h1_p), const_map),
            pl.BlockSpec((h1_p, h2_p), const_map),
            pl.BlockSpec((1, h2_p), const_map),
            pl.BlockSpec((h2_p, out_p), const_map),
            pl.BlockSpec((1, out_p), const_map),
        ],
        out_specs=pl.BlockSpec((tb, out_p), tile_map),
        compiler_params=pltpu.CompilerParams(
            dimension_semantics=("parallel",),
        ),
    )(x_p, w1_p, b1_p, w2_p, b2_p, w3_p, b3_p)

    return out[:batch, :out_features]


def init_params(key, in_features, hidden_sizes, output_size):
    """Deterministic init mimicking nn.Linear default (uniform in +-1/sqrt(fan_in)).

    Weights are stored as [in, out] (transposed vs. PyTorch's [out, in]).
    Biases are stored as [1, out] for in-kernel broadcasting.
    """
    params = []
    fan_in = in_features
    dims = list(hidden_sizes) + [output_size]
    for d in dims:
        key, wk, bk = jax.random.split(key, 3)
        bound = 1.0 / jnp.sqrt(jnp.float32(fan_in))
        w = jax.random.uniform(wk, (fan_in, d), jnp.float32, -bound, bound)
        b = jax.random.uniform(bk, (1, d), jnp.float32, -bound, bound)
        params.append((w, b))
        fan_in = d
    return params


def reference_forward(x, params):
    """Pure-JAX f32 reference (module semantics in eval mode)."""
    (w1, b1), (w2, b2), (w3, b3) = params
    h = jnp.maximum(x @ w1 + b1, 0.0)
    h = jnp.maximum(h @ w2 + b2, 0.0)
    return jax.nn.sigmoid(h @ w3 + b3)


def reference_forward_bf16(x, params):
    """Reference matching the kernel's mixed precision: bf16 matmul inputs, f32 accum."""
    (w1, b1), (w2, b2), (w3, b3) = params
    bf = lambda a: a.astype(jnp.bfloat16).astype(jnp.float32)
    h = jnp.maximum(bf(x) @ bf(w1) + b1, 0.0)
    h = jnp.maximum(bf(h) @ bf(w2) + b2, 0.0)
    return jax.nn.sigmoid(bf(h) @ bf(w3) + b3)


if __name__ == "__main__":
    # Small shapes consistent with the module (in_features fixed at 100 by __init__).
    batch = 4
    in_features = 100
    hidden_sizes = [64, 32]
    output_size = 8

    key = jax.random.PRNGKey(0)
    key, xk = jax.random.split(key)
    x = jax.random.normal(xk, (batch, in_features), jnp.float32)

    params = init_params(key, in_features, hidden_sizes, output_size)

    out = multilayer_dnn_forward(x, params)
    out = jax.block_until_ready(out)
    assert out.shape == (batch, output_size)

    # Tight check vs. a reference with identical mixed precision.
    ref_bf16 = reference_forward_bf16(x, params)
    assert jnp.allclose(out, ref_bf16, atol=1e-4, rtol=1e-4), \
        "mismatch vs. bf16-matched reference"

    # Loose check vs. the pure-f32 module semantics (bf16 matmul rounding only).
    ref_f32 = reference_forward(x, params)
    assert jnp.allclose(out, ref_f32, atol=2e-2, rtol=2e-2), \
        "mismatch vs. f32 reference"

    print("KERNEL_OK")
</pallas_src>

<mosaic_0001>
module attributes {stable_mosaic.version = 11 : i64} {
  func.func @_mlp_kernel(%arg0: i32, %arg1: memref<8x128xbf16, #tpu.memory_space<vmem>>, %arg2: memref<128x128xbf16, #tpu.memory_space<vmem>>, %arg3: memref<1x128xf32, #tpu.memory_space<vmem>>, %arg4: memref<128x128xbf16, #tpu.memory_space<vmem>>, %arg5: memref<1x128xf32, #tpu.memory_space<vmem>>, %arg6: memref<128x128xbf16, #tpu.memory_space<vmem>>, %arg7: memref<1x128xf32, #tpu.memory_space<vmem>>, %arg8: memref<8x128xf32, #tpu.memory_space<vmem>>) attributes {dimension_semantics = [#tpu.dimension_semantics<parallel>], iteration_bounds = array<i64: 1>, scalar_prefetch = 0 : i64, scratch_operands = 0 : i64, tpu.core_type = #tpu.core_type<tc>, window_params = [{transform_indices = @transform_0, window_bounds = array<i64: 8, 128>}, {pipeline_mode = #tpu.pipeline_mode<synchronous>, transform_indices = @transform_1, window_bounds = array<i64: 128, 128>}, {pipeline_mode = #tpu.pipeline_mode<synchronous>, transform_indices = @transform_2, window_bounds = array<i64: 1, 128>}, {pipeline_mode = #tpu.pipeline_mode<synchronous>, transform_indices = @transform_3, window_bounds = array<i64: 128, 128>}, {pipeline_mode = #tpu.pipeline_mode<synchronous>, transform_indices = @transform_4, window_bounds = array<i64: 1, 128>}, {pipeline_mode = #tpu.pipeline_mode<synchronous>, transform_indices = @transform_5, window_bounds = array<i64: 128, 128>}, {pipeline_mode = #tpu.pipeline_mode<synchronous>, transform_indices = @transform_6, window_bounds = array<i64: 1, 128>}, {transform_indices = @transform_7, window_bounds = array<i64: 8, 128>}]} {
    %c0 = arith.constant 0 : index
    %c0_0 = arith.constant 0 : index
    %0 = vector.load %arg1[%c0, %c0_0] : memref<8x128xbf16, #tpu.memory_space<vmem>>, vector<8x128xbf16>
    %c0_1 = arith.constant 0 : index
    %c0_2 = arith.constant 0 : index
    %1 = vector.load %arg2[%c0_1, %c0_2] : memref<128x128xbf16, #tpu.memory_space<vmem>>, vector<128x128xbf16>
    %cst = arith.constant dense<0.000000e+00> : vector<8x128xf32>
    %2 = tpu.matmul %0, %1, %cst {dimension_numbers = #tpu.dot_dimension_numbers<[1], [0], [0], [1], [0, 0, 1, 1], [], []>} : vector<8x128xbf16>, vector<128x128xbf16>, vector<8x128xf32> -> vector<8x128xf32>
    %c0_3 = arith.constant 0 : index
    %c0_4 = arith.constant 0 : index
    %3 = vector.load %arg3[%c0_3, %c0_4] : memref<1x128xf32, #tpu.memory_space<vmem>>, vector<1x128xf32>
    %4 = vector.broadcast %3 : vector<1x128xf32> to vector<8x128xf32>
    %5 = arith.addf %2, %4 : vector<8x128xf32>
    %cst_5 = arith.constant 0.000000e+00 : f32
    %6 = vector.broadcast %cst_5 : f32 to vector<8x128xf32>
    %7 = arith.maximumf %5, %6 : vector<8x128xf32>
    %8 = arith.truncf %7 : vector<8x128xf32> to vector<8x128xbf16>
    %c0_6 = arith.constant 0 : index
    %c0_7 = arith.constant 0 : index
    %9 = vector.load %arg4[%c0_6, %c0_7] : memref<128x128xbf16, #tpu.memory_space<vmem>>, vector<128x128xbf16>
    %cst_8 = arith.constant dense<0.000000e+00> : vector<8x128xf32>
    %10 = tpu.matmul %8, %9, %cst_8 {dimension_numbers = #tpu.dot_dimension_numbers<[1], [0], [0], [1], [0, 0, 1, 1], [], []>} : vector<8x128xbf16>, vector<128x128xbf16>, vector<8x128xf32> -> vector<8x128xf32>
    %c0_9 = arith.constant 0 : index
    %c0_10 = arith.constant 0 : index
    %11 = vector.load %arg5[%c0_9, %c0_10] : memref<1x128xf32, #tpu.memory_space<vmem>>, vector<1x128xf32>
    %12 = vector.broadcast %11 : vector<1x128xf32> to vector<8x128xf32>
    %13 = arith.addf %10, %12 : vector<8x128xf32>
    %cst_11 = arith.constant 0.000000e+00 : f32
    %14 = vector.broadcast %cst_11 : f32 to vector<8x128xf32>
    %15 = arith.maximumf %13, %14 : vector<8x128xf32>
    %16 = arith.truncf %15 : vector<8x128xf32> to vector<8x128xbf16>
    %c0_12 = arith.constant 0 : index
    %c0_13 = arith.constant 0 : index
    %17 = vector.load %arg6[%c0_12, %c0_13] : memref<128x128xbf16, #tpu.memory_space<vmem>>, vector<128x128xbf16>
    %cst_14 = arith.constant dense<0.000000e+00> : vector<8x128xf32>
    %18 = tpu.matmul %16, %17, %cst_14 {dimension_numbers = #tpu.dot_dimension_numbers<[1], [0], [0], [1], [0, 0, 1, 1], [], []>} : vector<8x128xbf16>, vector<128x128xbf16>, vector<8x128xf32> -> vector<8x128xf32>
    %c0_15 = arith.constant 0 : index
    %c0_16 = arith.constant 0 : index
    %19 = vector.load %arg7[%c0_15, %c0_16] : memref<1x128xf32, #tpu.memory_space<vmem>>, vector<1x128xf32>
    %20 = vector.broadcast %19 : vector<1x128xf32> to vector<8x128xf32>
    %21 = arith.addf %18, %20 : vector<8x128xf32>
    %22 = arith.negf %21 : vector<8x128xf32>
    %23 = math.exp %22 : vector<8x128xf32>
    %cst_17 = arith.constant 1.000000e+00 : f32
    %24 = vector.broadcast %cst_17 : f32 to vector<8x128xf32>
    %25 = arith.addf %24, %23 : vector<8x128xf32>
    %26 = arith.divf %24, %25 : vector<8x128xf32>
    %c0_18 = arith.constant 0 : index
    %c0_19 = arith.constant 0 : index
    %27 = vector.load %arg8[%c0_18, %c0_19] : memref<8x128xf32, #tpu.memory_space<vmem>>, vector<8x128xf32>
    tpu.vector_store %arg8[%c0_18, %c0_19], %26 {strides = array<i32>} : memref<8x128xf32, #tpu.memory_space<vmem>>, vector<8x128xf32>,
    return
  }
  func.func @transform_0(%arg0: i32) -> (i32, i32) {
    %c0_i32 = arith.constant 0 : i32
    %c0_i32_0 = arith.constant 0 : i32
    return %arg0, %c0_i32 : i32, i32
  }
  func.func @transform_1(%arg0: i32) -> (i32, i32) {
    %c0_i32 = arith.constant 0 : i32
    %c0_i32_0 = arith.constant 0 : i32
    %c0_i32_1 = arith.constant 0 : i32
    return %c0_i32, %c0_i32_0 : i32, i32
  }
  func.func @transform_2(%arg0: i32) -> (i32, i32) {
    %c0_i32 = arith.constant 0 : i32
    %c0_i32_0 = arith.constant 0 : i32
    %c0_i32_1 = arith.constant 0 : i32
    return %c0_i32, %c0_i32_0 : i32, i32
  }
  func.func @transform_3(%arg0: i32) -> (i32, i32) {
    %c0_i32 = arith.constant 0 : i32
    %c0_i32_0 = arith.constant 0 : i32
    %c0_i32_1 = arith.constant 0 : i32
    return %c0_i32, %c0_i32_0 : i32, i32
  }
  func.func @transform_4(%arg0: i32) -> (i32, i32) {
    %c0_i32 = arith.constant 0 : i32
    %c0_i32_0 = arith.constant 0 : i32
    %c0_i32_1 = arith.constant 0 : i32
    return %c0_i32, %c0_i32_0 : i32, i32
  }
  func.func @transform_5(%arg0: i32) -> (i32, i32) {
    %c0_i32 = arith.constant 0 : i32
    %c0_i32_0 = arith.constant 0 : i32
    %c0_i32_1 = arith.constant 0 : i32
    return %c0_i32, %c0_i32_0 : i32, i32
  }
  func.func @transform_6(%arg0: i32) -> (i32, i32) {
    %c0_i32 = arith.constant 0 : i32
    %c0_i32_0 = arith.constant 0 : i32
    %c0_i32_1 = arith.constant 0 : i32
    return %c0_i32, %c0_i32_0 : i32, i32
  }
  func.func @transform_7(%arg0: i32) -> (i32, i32) {
    %c0_i32 = arith.constant 0 : i32
    %c0_i32_0 = arith.constant 0 : i32
    return %arg0, %c0_i32 : i32, i32
  }
}

</mosaic_0001>

<bundles_post_ra>
// kernel: tpu_custom_call.1
= control target key start
LH: loop header
LB: loop body
LE: loop exit
PB: predicated region body
PF: predicated region fallthrough
CT: control target
= control target key end

     0   :  { %12 = vsyncpa [#allocation3], 0  ;;  %s870_s0 = inlined_call_operand.hbm [shape: bf16[8,128], index: 0, kind: input, shape index: {}]   ;;  %s871_s1 = inlined_call_operand.hbm [shape: bf16[128,128], index: 1, kind: input, shape index: {}]   ;;  %s872_s2 = inlined_call_operand.vmem [shape: f32[1,128], index: 2, kind: input, shape index: {}]   ;;  %s873_s3 = inlined_call_operand.hbm [shape: bf16[128,128], index: 3, kind: input, shape index: {}]   ;;  %s874_s4 = inlined_call_operand.vmem [shape: f32[1,128], index: 4, kind: input, shape index: {}]   ;;  %s875_s5 = inlined_call_operand.hbm [shape: bf16[128,128], index: 5, kind: input, shape index: {}]   ;;  %s876_s6 = inlined_call_operand.vmem [shape: f32[1,128], index: 6, kind: input, shape index: {}]   ;;  %s877_s7 = inlined_call_operand.hbm [shape: f32[8,128], index: 7, kind: output, shape index: {}]  }
   0x1   :  { %13 = vsyncpa [#allocation6], 0 }
   0x2   :  { %14 = vsyncpa [#allocation9], 0 }
   0x3   :  { %15 = vsyncpa [#allocation4], 0  ;;  %s713_s24 = smov [#allocation5]   ;;  %s595_s28 = scalar_lea.hbm %s871_s1, 1024 }
   0x4   :  { %s31_s25 = sshll.u32 %s713_s24, 4  ;;  %p596_p0 = scmp.ne.s32.totalorder %s871_s1, %s595_s28  ;;  %s32_s25 = int_to_ptr.vmem [resolvable:$true] %s31_s25 }
   0x5   :  { %p599_p1 = scmp.lt.u32.totalorder %s595_s28, %s871_s1 }
   0x7   :  { %p601_p2 = pnand %p599_p1, %p596_p0 }
   0x9   :  { %604 = shalt.err (!%p601_p2)
}
   0xa   :  { %s605_s10 = scalar_lea.vmem %s32_s25, 1024  ;;  %p610_p4 = scmp.lt.s32.totalorder %s32_s25, %s32_s25 }
   0xb   :  { %p606_p3 = scmp.ne.s32.totalorder %s32_s25, %s605_s10  ;;  %p611_p5 = scmp.lt.s32.totalorder %s605_s10, %s605_s10 }
   0xd   :  { %p612_p6 = por %p611_p5, %p610_p4 }
   0xf   :  { %p613_p7 = pnand %p612_p6, %p606_p3 }
  0x11   :  { %616 = shalt.err (!%p613_p7)
}
  0x12   :  { %s714_s11 = smov 64   ;;  %s715_s12 = smov 4  }
  0x13   :  { %37 = dma.hbm_to_vmem [thread:$0]  %s871_s1, 1024, %s32_s25, [#allocation6], %s714_s11, %s714_s11, %s715_s12  }
  0x14   :  { %s716_s15 = smov [#allocation2]   ;;  %s717_s17 = smov [#allocation7]  }
  0x15   :  { %s22_s16 = sshll.u32 %s716_s15, 4  ;;  %s45_s18 = sshll.u32 %s717_s17, 4  ;;  %s23_s16 = int_to_ptr.vmem [resolvable:$true] %s22_s16  ;;  %s46_s18 = int_to_ptr.vmem [resolvable:$true] %s45_s18 }
  0x16   :  { %s617_s21 = scalar_lea.hbm %s870_s0, 64 }
  0x17   :  { %p618_p8 = scmp.ne.s32.totalorder %s870_s0, %s617_s21  ;;  %p621_p9 = scmp.lt.u32.totalorder %s617_s21, %s870_s0 }
  0x19   :  { %p623_p10 = pnand %p621_p9, %p618_p8 }
  0x1b   :  { %626 = shalt.err (!%p623_p10)
}
  0x1c   :  { %s627_s1 = scalar_lea.vmem %s23_s16, 64  ;;  %p632_p12 = scmp.lt.s32.totalorder %s23_s16, %s23_s16 }
  0x1d   :  { %p628_p11 = scmp.ne.s32.totalorder %s23_s16, %s627_s1  ;;  %p633_p13 = scmp.lt.s32.totalorder %s627_s1, %s627_s1 }
  0x1f   :  { %p634_p0 = por %p633_p13, %p632_p12 }
  0x21   :  { %p635_p1 = pnand %p634_p0, %p628_p11 }
  0x23   :  { %638 = shalt.err (!%p635_p1)
}
  0x24   :  { %25 = dma.hbm_to_vmem [thread:$0]  %s870_s0, 64, %s23_s16, [#allocation3]  }
  0x25   :  { %s639_s30 = scalar_lea.hbm %s873_s3, 1024 }
  0x26   :  { %p640_p2 = scmp.ne.s32.totalorder %s873_s3, %s639_s30  ;;  %p643_p3 = scmp.lt.u32.totalorder %s639_s30, %s873_s3 }
  0x28   :  { %p645_p4 = pnand %p643_p3, %p640_p2 }
  0x2a   :  { %648 = shalt.err (!%p645_p4)
}
  0x2b   :  { %s649_s14 = scalar_lea.vmem %s46_s18, 1024  ;;  %p654_p6 = scmp.lt.s32.totalorder %s46_s18, %s46_s18 }
  0x2c   :  { %p650_p5 = scmp.ne.s32.totalorder %s46_s18, %s649_s14  ;;  %p655_p7 = scmp.lt.s32.totalorder %s649_s14, %s649_s14 }
  0x2e   :  { %p656_p8 = por %p655_p7, %p654_p6 }
  0x30   :  { %p657_p9 = pnand %p656_p8, %p650_p5 }
  0x32   :  { %660 = shalt.err (!%p657_p9)
}
  0x33   :  { %51 = dma.hbm_to_vmem [thread:$0]  %s873_s3, 1024, %s46_s18, [#allocation6], %s714_s11, %s714_s11, %s715_s12  }
  0x34   :  { %s718_s16 = smov [#allocation8]   ;;  %s661_s21 = scalar_lea.hbm %s875_s5, 1024 }
  0x35   :  { %s59_s17 = sshll.u32 %s718_s16, 4  ;;  %p662_p10 = scmp.ne.s32.totalorder %s875_s5, %s661_s21  ;;  %s60_s17 = int_to_ptr.vmem [resolvable:$true] %s59_s17 }
  0x36   :  { %p665_p11 = scmp.lt.u32.totalorder %s661_s21, %s875_s5 }
  0x38   :  { %p667_p12 = pnand %p665_p11, %p662_p10 }
  0x3a   :  { %670 = shalt.err (!%p667_p12)
}
  0x3b   :  { %s671_s1 = scalar_lea.vmem %s60_s17, 1024  ;;  %p676_p0 = scmp.lt.s32.totalorder %s60_s17, %s60_s17 }
  0x3c   :  { %p672_p13 = scmp.ne.s32.totalorder %s60_s17, %s671_s1  ;;  %p677_p1 = scmp.lt.s32.totalorder %s671_s1, %s671_s1 }
  0x3e   :  { %p678_p2 = por %p677_p1, %p676_p0 }
  0x40   :  { %p679_p3 = pnand %p678_p2, %p672_p13 }
  0x42   :  { %682 = shalt.err (!%p679_p3)
}
  0x43   :  { %65 = dma.hbm_to_vmem [thread:$0]  %s875_s5, 1024, %s60_s17, [#allocation9], %s714_s11, %s714_s11, %s715_s12  }
  0x44   :  { %705 = dma.done.wait [#allocation3], 64  }
  0x45   :  { %706 = vsyncadd [#allocation3], 4294967232 }
  0x46   :  { %707 = dma.done.wait [#allocation6], 2048  }
  0x47   :  { %708 = vsyncadd [#allocation6], 4294965248 }
  0x48   :  { %709 = dma.done.wait [#allocation9], 1024  }
  0x49   :  { %710 = vsyncadd [#allocation9], 4294966272  ;;  %v719_v0 = vmov 0.0   ;;  %vm720_vm0 = vmmov 0   ;;  %v567_v1 = vld [vmem:[#allocation5] sm:$0xff]   ;;  %v568_v2 = vld [vmem:[#allocation5 + $0x8] sm:$0xff]  }
  0x4a   :  { %498 = vmatprep.subr.bf16.mxu0 %v719_v0  ;;  %514 = vmatprep.mubr.msk.bf16.mxu0 %vm720_vm0, %v719_v0  ;;  %v569_v3 = vld [vmem:[#allocation5 + $0x10] sm:$0xff]   ;;  %v575_v4 = vld [vmem:[#allocation7] sm:$0xff]   ;;  %v570_v5 = vld [vmem:[#allocation5 + $0x18] sm:$0xff]  }
  0x4b   :  { %518 = vmatprep.subr.bf16.mxu1 %v719_v0  ;;  %534 = vmatprep.mubr.msk.bf16.mxu1 %vm720_vm0, %v719_v0  ;;  %v576_v6 = vld [vmem:[#allocation7 + $0x8] sm:$0xff]   ;;  %v571_v7 = vld [vmem:[#allocation5 + $0x20] sm:$0xff]   ;;  %v577_v8 = vld [vmem:[#allocation7 + $0x10] sm:$0xff]  }
  0x4c   :  { %499 = vmatpush3.bf16.msra.mxu0 %v567_v1  ;;  %519 = vmatpush3.bf16.msra.mxu1 %v575_v4  ;;  %v572_v9 = vld [vmem:[#allocation5 + $0x28] sm:$0xff]   ;;  %v578_v10 = vld [vmem:[#allocation7 + $0x18] sm:$0xff]   ;;  %v573_v11 = vld [vmem:[#allocation5 + $0x30] sm:$0xff]  }
  0x4d   :  { %500 = vmatprep.subr.bf16.mxu0 %v719_v0  ;;  %520 = vmatprep.subr.bf16.mxu1 %v719_v0  ;;  %v579_v12 = vld [vmem:[#allocation7 + $0x20] sm:$0xff]   ;;  %v574_v13 = vld [vmem:[#allocation5 + $0x38] sm:$0xff]   ;;  %v580_v14 = vld [vmem:[#allocation7 + $0x28] sm:$0xff]  }
  0x4e   :  { %v81_v15 = vld [vmem:[#allocation2] sm:$0xf]  ;;  %v581_v16 = vld [vmem:[#allocation7 + $0x30] sm:$0xff]   ;;  %v583_v18 = vld [vmem:[#allocation8] sm:$0xff]  }
  0x4f   :  { %v582_v17 = vld [vmem:[#allocation7 + $0x38] sm:$0xff]   ;;  %v584_v19 = vld [vmem:[#allocation8 + $0x8] sm:$0xff]   ;;  %v585_v20 = vld [vmem:[#allocation8 + $0x10] sm:$0xff]  }
  0x50   :  { %501 = vmatpush3.bf16.msra.mxu0 %v568_v2  ;;  %521 = vmatpush3.bf16.msra.mxu1 %v576_v6  ;;  %v586_v21 = vld [vmem:[#allocation8 + $0x18] sm:$0xff]   ;;  %v587_v22 = vld [vmem:[#allocation8 + $0x20] sm:$0xff]   ;;  %v588_v23 = vld [vmem:[#allocation8 + $0x28] sm:$0xff]  }
  0x51   :  { %502 = vmatprep.subr.bf16.mxu0 %v719_v0  ;;  %522 = vmatprep.subr.bf16.mxu1 %v719_v0  ;;  %v443_v24 = vld [vmem:[%s872_s2] ss:$0 sm:$0xff]  ;;  %v589_v32 = vld [vmem:[#allocation8 + $0x30] sm:$0xff]  }
  0x52   :  { %v590_v33 = vld [vmem:[#allocation8 + $0x38] sm:$0xff]  }
  0x53   :  { %v452_v34 = vld [vmem:[%s874_s4] ss:$0 sm:$0xff]  ;;  %s721_s4 = smov [#allocation10]  }
  0x54   :  { %503 = vmatpush3.bf16.msra.mxu0 %v569_v3  ;;  %523 = vmatpush3.bf16.msra.mxu1 %v577_v8  ;;  %v461_v42 = vld [vmem:[%s876_s6] ss:$0 sm:$0xff]  ;;  %s432_s28 = sshll.u32 %s721_s4, 4  ;;  %s433_s28 = int_to_ptr.vmem [resolvable:$true] %s432_s28 }
  0x55   :  { %504 = vmatprep.subr.bf16.mxu0 %v719_v0  ;;  %524 = vmatprep.subr.bf16.mxu1 %v719_v0  ;;  %s683_s29 = scalar_lea.vmem %s433_s28, 128  ;;  %p688_p5 = scmp.lt.s32.totalorder %s433_s28, %s433_s28 }
  0x56   :  { %p684_p4 = scmp.ne.s32.totalorder %s433_s28, %s683_s29  ;;  %p689_p6 = scmp.lt.s32.totalorder %s683_s29, %s683_s29 }
  0x58   :  { %505 = vmatpush3.bf16.msra.mxu0 %v570_v5  ;;  %525 = vmatpush3.bf16.msra.mxu1 %v578_v10  ;;  %p690_p7 = por %p689_p6, %p688_p5 }
  0x59   :  { %506 = vmatprep.subr.bf16.mxu0 %v719_v0  ;;  %526 = vmatprep.subr.bf16.mxu1 %v719_v0 }
  0x5a   :  { %p691_p8 = pnand %p690_p7, %p684_p4 }
  0x5c   :  { %507 = vmatpush3.bf16.msra.mxu0 %v571_v7  ;;  %527 = vmatpush3.bf16.msra.mxu1 %v579_v12 }
  0x5d   :  { %508 = vmatprep.subr.bf16.mxu0 %v719_v0  ;;  %528 = vmatprep.subr.bf16.mxu1 %v719_v0 }
  0x60   :  { %509 = vmatpush3.bf16.msra.mxu0 %v572_v9  ;;  %529 = vmatpush3.bf16.msra.mxu1 %v580_v14 }
  0x61   :  { %510 = vmatprep.subr.bf16.mxu0 %v719_v0  ;;  %530 = vmatprep.subr.bf16.mxu1 %v719_v0 }
  0x64   :  { %511 = vmatpush3.bf16.msra.mxu0 %v573_v11  ;;  %531 = vmatpush3.bf16.msra.mxu1 %v581_v16 }
  0x65   :  { %512 = vmatprep.subr.bf16.mxu0 %v719_v0  ;;  %532 = vmatprep.subr.bf16.mxu1 %v719_v0 }
  0x68   :  { %513 = vmatpush3.bf16.msra.mxu0 %v574_v13  ;;  %533 = vmatpush3.bf16.msra.mxu1 %v582_v17 }
  0x69   :  { %538 = vmatprep.subr.bf16.mxu0 %v719_v0 }
  0x6b   :  { %515 = vmatmul.mubr.bf16.vlgmr.msra.gmra.mrb[0].mxu0 %v81_v15 }
  0x6c   :  { %554 = vmatprep.mubr.msk.bf16.mxu0 %vm720_vm0, %v719_v0  ;;  %539 = vmatpush3.bf16.msra.mxu0 %v583_v18 }
  0x6d   :  { %540 = vmatprep.subr.bf16.mxu0 %v719_v0 }
  0x70   :  { %541 = vmatpush3.bf16.msra.mxu0 %v584_v19 }
  0x71   :  { %542 = vmatprep.subr.bf16.mxu0 %v719_v0 }
  0x74   :  { %543 = vmatpush3.bf16.msra.mxu0 %v585_v20 }
  0x75   :  { %544 = vmatprep.subr.bf16.mxu0 %v719_v0 }
  0x78   :  { %545 = vmatpush3.bf16.msra.mxu0 %v586_v21 }
  0x79   :  { %546 = vmatprep.subr.bf16.mxu0 %v719_v0 }
  0x7c   :  { %547 = vmatpush3.bf16.msra.mxu0 %v587_v22 }
  0x7d   :  { %548 = vmatprep.subr.bf16.mxu0 %v719_v0 }
  0x80   :  { %549 = vmatpush3.bf16.msra.mxu0 %v588_v23 }
  0x81   :  { %550 = vmatprep.subr.bf16.mxu0 %v719_v0 }
  0x84   :  { %551 = vmatpush3.bf16.msra.mxu0 %v589_v32 }
  0x85   :  { %552 = vmatprep.subr.bf16.mxu0 %v719_v0 }
  0x88   :  { %553 = vmatpush3.bf16.msra.mxu0 %v590_v33 }
 0x13e   :  { %v187_v25 = vpop.f32.mrb[0].mxu0 }
 0x13f   :  { %v188_v26 = vadd.f32 %v443_v24, %v187_v25  ;;  %v516_v27 = vpop.f32.mrb[1].mxu0 }
 0x140   :  { %v190_v28 = vpop.f32.mrb[2].mxu0 }
 0x141   :  { %v193_v29 = vmax.f32 %v188_v26, 0.0  ;;  %v517_v30 = vpop.f32.mrb[3].mxu0 }
 0x143   :  { %v194_v31 = vpack.c.bf16 %v193_v29, %v193_v29 }
 0x145   :  { %535 = vmatmul.mubr.bf16.vlgmr.msra.gmra.mrb[0].mxu1 %v194_v31 }
 0x218   :  { %v300_v35 = vpop.f32.mrb[0].mxu1 }
 0x219   :  { %v301_v36 = vadd.f32 %v452_v34, %v300_v35  ;;  %v536_v37 = vpop.f32.mrb[1].mxu1 }
 0x21a   :  { %v303_v38 = vpop.f32.mrb[2].mxu1 }
 0x21b   :  { %v306_v39 = vmax.f32 %v301_v36, 0.0  ;;  %v537_v40 = vpop.f32.mrb[3].mxu1 }
 0x21d   :  { %v307_v41 = vpack.c.bf16 %v306_v39, %v306_v39 }
 0x21f   :  { %555 = vmatmul.mubr.bf16.vlgmr.msra.gmra.mrb[4].mxu0 %v307_v41 }
 0x2f2   :  { %v413_v43 = vpop.f32.mrb[4].mxu0 }
 0x2f3   :  { %v414_v44 = vadd.f32 %v461_v42, %v413_v43  ;;  %v556_v45 = vpop.f32.mrb[5].mxu0 }
 0x2f4   :  { %v416_v46 = vpop.f32.mrb[6].mxu0 }
 0x2f5   :  { %v470_v47 = vmul.f32 -1.442695, %v414_v44  ;;  %v557_v48 = vpop.f32.mrb[7].mxu0 }
 0x2f7   :  { %591 = vpow2.f32 %v470_v47 }
 0x301   :  { %v592_v49 = vpop.eup %591 }
 0x302   :  { %v422_v50 = vadd.f32 1.0, %v592_v49 }
 0x304   :  { %593 = vrcp.f32 %v422_v50 }
 0x30e   :  { %v594_v51 = vpop.eup %593 }
 0x30f   :  { %425 = vst [vmem:[#allocation10] sm:$0xff] %v594_v51 }
 0x310   :  { %694 = shalt.err (!%p691_p8)
}
 0x311   :  { %s695_s8 = scalar_lea.hbm %s877_s7, 128 }
 0x312   :  { %p696_p9 = scmp.ne.s32.totalorder %s877_s7, %s695_s8  ;;  %p699_p10 = scmp.lt.u32.totalorder %s695_s8, %s877_s7 }
 0x314   :  { %p701_p11 = pnand %p699_p10, %p696_p9 }
 0x316   :  { %704 = shalt.err (!%p701_p11)
}
 0x317   :  { %435 = dma.vmem_to_hbm [thread:$0]  %s433_s28, 128, %s877_s7, [#allocation4]  }
 0x318   :  { %711 = dma.done.wait [#allocation4], 128  }
 0x319   :  { %712 = vsyncadd [#allocation4], 4294967168 }
 0x31a   :  { %439 = vsyncpa [#allocation3], 1 }
 0x31b   :  { %440 = vsyncpa [#allocation6], 1 }
 0x31c   :  { %441 = vsyncpa [#allocation9], 1 }
 0x31d   :  { %442 = vsyncpa [#allocation4], 1 }

</bundles_post_ra>
